<compile_context>
chip_gen: v5e
topology: v5e:2x2
jax: 0.10.0
libtpu: 0.0.40
codegen_flags: <defaults>
</compile_context>

<pallas_src>
import functools

import jax
import jax.numpy as jnp
from jax import lax
from jax.experimental import pallas as pl
from jax.experimental.pallas import tpu as pltpu

HIDDEN = 128  # padded lane width shared by all layers / heads


def a2c_kernel(data_ref, p_ref, heads_ref, act_ref, *, batch, actions, bp):
    """data_ref : (2*bp, 128)   = [x_padded ; noise_padded]
       p_ref    : (4*128+8,128) = [W1 ; W2 ; W3 ; W_heads ; biases(8 rows)]
       heads_ref: (bp, 128)     cols[:actions]=action_values, col[actions]=value
       act_ref  : (1,) int32    flattened Gumbel argmax (torch.argmax, no dim)
    """
    x = data_ref[0:bp, :]
    noise = data_ref[bp:2 * bp, :]

    # fc1, fc2, fc3 with ReLU — one (8,128)x(128,128) MXU push per layer.
    h = x
    for layer in range(3):
        w = p_ref[layer * HIDDEN:(layer + 1) * HIDDEN, :]
        b = p_ref[4 * HIDDEN + layer:4 * HIDDEN + layer + 1, :]
        h = jnp.maximum(
            jnp.dot(h, w, preferred_element_type=jnp.float32) + b, 0.0)

    # Fused actor|critic head: one MXU push, one lane-dense store.
    wh = p_ref[3 * HIDDEN:4 * HIDDEN, :]
    bh = p_ref[4 * HIDDEN + 3:4 * HIDDEN + 4, :]
    heads = jnp.dot(h, wh, preferred_element_type=jnp.float32) + bh
    heads_ref[...] = heads

    # action = argmax over the flattened (batch, actions) region of
    # action_values - log(-log(noise)); first occurrence on exact ties.
    row = lax.broadcasted_iota(jnp.int32, heads.shape, 0)
    col = lax.broadcasted_iota(jnp.int32, heads.shape, 1)
    valid = (row < batch) & (col < actions)
    gumbel = jnp.where(valid, heads - jnp.log(-jnp.log(noise)), -jnp.inf)
    m = jnp.max(gumbel)
    flat_idx = row * actions + col
    idx = jnp.where(valid & (gumbel == m), flat_idx, batch * actions)
    act_ref[0] = jnp.min(idx).astype(jnp.int32)


def pack_params(params):
    """Pack the 10 Linear tensors into one zero-padded (4*128+8, 128) slab.
    Weights are stored (in, out): y = x @ W + b  ==  PyTorch x @ W.T + b."""
    def pad(a, rows, cols):
        out = jnp.zeros((rows, cols), jnp.float32)
        return out.at[:a.shape[0], :a.shape[1]].set(a.astype(jnp.float32))

    w1 = pad(params["w1"], HIDDEN, HIDDEN)
    w2 = pad(params["w2"], HIDDEN, HIDDEN)
    w3 = pad(params["w3"], HIDDEN, HIDDEN)
    # actor and critic weights fused side-by-side: cols [:A]=actor, [A]=critic
    wh = pad(jnp.concatenate([params["wa"], params["wc"]], axis=1), HIDDEN, HIDDEN)

    biases = jnp.zeros((8, HIDDEN), jnp.float32)
    biases = biases.at[0, :params["b1"].shape[1]].set(params["b1"][0])
    biases = biases.at[1, :params["b2"].shape[1]].set(params["b2"][0])
    biases = biases.at[2, :params["b3"].shape[1]].set(params["b3"][0])
    bh = jnp.concatenate([params["ba"], params["bc"]], axis=1)
    biases = biases.at[3, :bh.shape[1]].set(bh[0])

    return jnp.concatenate([w1, w2, w3, wh, biases], axis=0)  # (520, 128)


@functools.partial(jax.jit, static_argnames=("action_shape",))
def network_forward(x, param_slab, noise, *, action_shape):
    B, F = x.shape
    A = action_shape
    BP = max(8, ((B + 7) // 8) * 8)  # pad batch to full sublanes

    x_pad = jnp.zeros((BP, HIDDEN), jnp.float32).at[:B, :F].set(x)
    # pad noise with 0.5 so log(-log(.)) stays finite on dead lanes (masked anyway)
    noise_pad = jnp.full((BP, HIDDEN), 0.5, jnp.float32).at[:B, :A].set(noise)
    data = jnp.concatenate([x_pad, noise_pad], axis=0)  # (2*BP, 128)

    vmem = pl.BlockSpec(memory_space=pltpu.MemorySpace.VMEM)
    smem = pl.BlockSpec(memory_space=pltpu.MemorySpace.SMEM)

    heads, act = pl.pallas_call(
        functools.partial(a2c_kernel, batch=B, actions=A, bp=BP),
        out_shape=(
            jax.ShapeDtypeStruct((BP, HIDDEN), jnp.float32),  # fused av|value
            jax.ShapeDtypeStruct((1,), jnp.int32),            # action scalar
        ),
        in_specs=[vmem, vmem],
        out_specs=(vmem, smem),
        # NOTE(v7x): at production batch sizes, add grid=(BP//tile,) over rows
        # with dimension_semantics=("parallel",) so both TensorCores are used;
        # unnecessary (pure overhead) at this tiny shape.
    )(data, param_slab)

    action_values = heads[:B, :A]
    value = heads[:B, A:A + 1]
    return act[0], action_values, value


if __name__ == "__main__":
    key = jax.random.PRNGKey(0)
    feature_shape, action_shape, batch = 8, 4, 2
    ks = jax.random.split(key, 12)

    def init(k, shape):
        return 0.1 * jax.random.normal(k, shape, jnp.float32)

    params = {
        "w1": init(ks[0], (feature_shape, 10)), "b1": init(ks[1], (1, 10)),
        "w2": init(ks[2], (10, 20)),            "b2": init(ks[3], (1, 20)),
        "w3": init(ks[4], (20, 20)),            "b3": init(ks[5], (1, 20)),
        "wa": init(ks[6], (20, action_shape)),  "ba": init(ks[7], (1, action_shape)),
        "wc": init(ks[8], (20, 1)),             "bc": init(ks[9], (1, 1)),
    }
    param_slab = jax.block_until_ready(pack_params(params))  # built once, reused

    x = jax.random.normal(ks[10], (batch, feature_shape), jnp.float32)
    # torch.rand -> U[0,1); clamp away from 0 so log(-log(u)) is finite.
    noise = jax.random.uniform(ks[11], (batch, action_shape), jnp.float32,
                               minval=1e-6, maxval=1.0)

    action, action_values, value = network_forward(
        x, param_slab, noise, action_shape=action_shape)
    jax.block_until_ready((action, action_values, value))

    # pure-JAX reference check
    def ref(x, p, noise):
        h1 = jax.nn.relu(x @ p["w1"] + p["b1"])
        h2 = jax.nn.relu(h1 @ p["w2"] + p["b2"])
        h3 = jax.nn.relu(h2 @ p["w3"] + p["b3"])
        av = h3 @ p["wa"] + p["ba"]
        val = h3 @ p["wc"] + p["bc"]
        act = jnp.argmax(av - jnp.log(-jnp.log(noise)))
        return act, av, val

    ract, rav, rval = ref(x, params, noise)
    assert jnp.allclose(action_values, rav, atol=1e-4, rtol=1e-4)
    assert jnp.allclose(value, rval, atol=1e-4, rtol=1e-4)
    assert int(action) == int(ract)
    print("KERNEL_OK")
</pallas_src>

<mosaic_0001>
module attributes {stable_mosaic.version = 11 : i64} {
  func.func @a2c_kernel(%arg0: memref<16x128xf32, #tpu.memory_space<vmem>>, %arg1: memref<520x128xf32, #tpu.memory_space<vmem>>, %arg2: memref<8x128xf32, #tpu.memory_space<vmem>>, %arg3: memref<1xi32, #tpu.memory_space<smem>>) attributes {dimension_semantics = [], scalar_prefetch = 0 : i64, scratch_operands = 0 : i64, tpu.core_type = #tpu.core_type<tc>} {
    %c0 = arith.constant 0 : index
    %c0_0 = arith.constant 0 : index
    %0 = vector.load %arg0[%c0, %c0_0] : memref<16x128xf32, #tpu.memory_space<vmem>>, vector<8x128xf32>
    %c8 = arith.constant 8 : index
    %c0_1 = arith.constant 0 : index
    %1 = vector.load %arg0[%c8, %c0_1] : memref<16x128xf32, #tpu.memory_space<vmem>>, vector<8x128xf32>
    %c0_2 = arith.constant 0 : index
    %c0_3 = arith.constant 0 : index
    %2 = vector.load %arg1[%c0_2, %c0_3] : memref<520x128xf32, #tpu.memory_space<vmem>>, vector<128x128xf32>
    %c512 = arith.constant 512 : index
    %c0_4 = arith.constant 0 : index
    %3 = vector.load %arg1[%c512, %c0_4] : memref<520x128xf32, #tpu.memory_space<vmem>>, vector<1x128xf32>
    %cst = arith.constant dense<0.000000e+00> : vector<8x128xf32>
    %4 = tpu.matmul %0, %2, %cst {dimension_numbers = #tpu.dot_dimension_numbers<[1], [0], [0], [1], [0, 0, 1, 1], [], []>} : vector<8x128xf32>, vector<128x128xf32>, vector<8x128xf32> -> vector<8x128xf32>
    %5 = vector.broadcast %3 : vector<1x128xf32> to vector<8x128xf32>
    %6 = arith.addf %4, %5 : vector<8x128xf32>
    %cst_5 = arith.constant 0.000000e+00 : f32
    %7 = vector.broadcast %cst_5 : f32 to vector<8x128xf32>
    %8 = arith.maximumf %6, %7 : vector<8x128xf32>
    %c128 = arith.constant 128 : index
    %c0_6 = arith.constant 0 : index
    %9 = vector.load %arg1[%c128, %c0_6] : memref<520x128xf32, #tpu.memory_space<vmem>>, vector<128x128xf32>
    %c513 = arith.constant 513 : index
    %c0_7 = arith.constant 0 : index
    %10 = vector.load %arg1[%c513, %c0_7] : memref<520x128xf32, #tpu.memory_space<vmem>>, vector<1x128xf32>
    %cst_8 = arith.constant dense<0.000000e+00> : vector<8x128xf32>
    %11 = tpu.matmul %8, %9, %cst_8 {dimension_numbers = #tpu.dot_dimension_numbers<[1], [0], [0], [1], [0, 0, 1, 1], [], []>} : vector<8x128xf32>, vector<128x128xf32>, vector<8x128xf32> -> vector<8x128xf32>
    %12 = vector.broadcast %10 : vector<1x128xf32> to vector<8x128xf32>
    %13 = arith.addf %11, %12 : vector<8x128xf32>
    %cst_9 = arith.constant 0.000000e+00 : f32
    %14 = vector.broadcast %cst_9 : f32 to vector<8x128xf32>
    %15 = arith.maximumf %13, %14 : vector<8x128xf32>
    %c256 = arith.constant 256 : index
    %c0_10 = arith.constant 0 : index
    %16 = vector.load %arg1[%c256, %c0_10] : memref<520x128xf32, #tpu.memory_space<vmem>>, vector<128x128xf32>
    %c514 = arith.constant 514 : index
    %c0_11 = arith.constant 0 : index
    %17 = vector.load %arg1[%c514, %c0_11] : memref<520x128xf32, #tpu.memory_space<vmem>>, vector<1x128xf32>
    %cst_12 = arith.constant dense<0.000000e+00> : vector<8x128xf32>
    %18 = tpu.matmul %15, %16, %cst_12 {dimension_numbers = #tpu.dot_dimension_numbers<[1], [0], [0], [1], [0, 0, 1, 1], [], []>} : vector<8x128xf32>, vector<128x128xf32>, vector<8x128xf32> -> vector<8x128xf32>
    %19 = vector.broadcast %17 : vector<1x128xf32> to vector<8x128xf32>
    %20 = arith.addf %18, %19 : vector<8x128xf32>
    %cst_13 = arith.constant 0.000000e+00 : f32
    %21 = vector.broadcast %cst_13 : f32 to vector<8x128xf32>
    %22 = arith.maximumf %20, %21 : vector<8x128xf32>
    %c384 = arith.constant 384 : index
    %c0_14 = arith.constant 0 : index
    %23 = vector.load %arg1[%c384, %c0_14] : memref<520x128xf32, #tpu.memory_space<vmem>>, vector<128x128xf32>
    %c515 = arith.constant 515 : index
    %c0_15 = arith.constant 0 : index
    %24 = vector.load %arg1[%c515, %c0_15] : memref<520x128xf32, #tpu.memory_space<vmem>>, vector<1x128xf32>
    %cst_16 = arith.constant dense<0.000000e+00> : vector<8x128xf32>
    %25 = tpu.matmul %22, %23, %cst_16 {dimension_numbers = #tpu.dot_dimension_numbers<[1], [0], [0], [1], [0, 0, 1, 1], [], []>} : vector<8x128xf32>, vector<128x128xf32>, vector<8x128xf32> -> vector<8x128xf32>
    %26 = vector.broadcast %24 : vector<1x128xf32> to vector<8x128xf32>
    %27 = arith.addf %25, %26 : vector<8x128xf32>
    %c0_17 = arith.constant 0 : index
    %c0_18 = arith.constant 0 : index
    %28 = vector.load %arg2[%c0_17, %c0_18] : memref<8x128xf32, #tpu.memory_space<vmem>>, vector<8x128xf32>
    tpu.vector_store %arg2[%c0_17, %c0_18], %27 {strides = array<i32>} : memref<8x128xf32, #tpu.memory_space<vmem>>, vector<8x128xf32>,
    %29 = tpu.iota {dimensions = array<i32: 0>} : vector<8x128xi32>
    %30 = tpu.iota {dimensions = array<i32: 1>} : vector<8x128xi32>
    %c2_i32 = arith.constant 2 : i32
    %31 = vector.broadcast %c2_i32 : i32 to vector<8x128xi32>
    %32 = arith.cmpi slt, %29, %31 : vector<8x128xi32>
    %c4_i32 = arith.constant 4 : i32
    %33 = vector.broadcast %c4_i32 : i32 to vector<8x128xi32>
    %34 = arith.cmpi slt, %30, %33 : vector<8x128xi32>
    %35 = arith.andi %32, %34 : vector<8x128xi1>
    %36 = math.log %1 : vector<8x128xf32>
    %cst_19 = arith.constant 0.000000e+00 : f32
    %37 = vector.broadcast %cst_19 : f32 to vector<8x128xf32>
    %38 = arith.subf %37, %36 : vector<8x128xf32>
    %39 = math.log %38 : vector<8x128xf32>
    %40 = arith.subf %27, %39 : vector<8x128xf32>
    %cst_20 = arith.constant 0xFF800000 : f32
    %41 = vector.broadcast %cst_20 : f32 to vector<8x128xf32>
    %42 = arith.select %35, %40, %41 : vector<8x128xi1>, vector<8x128xf32>
    %43 = vector.shape_cast %42 : vector<8x128xf32> to vector<1x8x128xf32>
    %cst_21 = arith.constant dense<0xFF800000> : vector<1xf32>
    %44 = vector.multi_reduction <maximumf>, %43, %cst_21 [1, 2] : vector<1x8x128xf32> to vector<1xf32>
    %45 = vector.shape_cast %44 : vector<1xf32> to vector<1x1x1xf32>
    %46 = vector.extract %45[0, 0, 0] : f32 from vector<1x1x1xf32>
    %c4_i32_22 = arith.constant 4 : i32
    %47 = vector.broadcast %c4_i32_22 : i32 to vector<8x128xi32>
    %48 = arith.muli %29, %47 : vector<8x128xi32>
    %49 = arith.addi %48, %30 : vector<8x128xi32>
    %50 = vector.broadcast %46 : f32 to vector<8x128xf32>
    %51 = arith.cmpf oeq, %42, %50 : vector<8x128xf32>
    %52 = arith.andi %35, %51 : vector<8x128xi1>
    %c8_i32 = arith.constant 8 : i32
    %53 = vector.broadcast %c8_i32 : i32 to vector<8x128xi32>
    %54 = arith.select %52, %49, %53 : vector<8x128xi1>, vector<8x128xi32>
    %55 = vector.shape_cast %54 : vector<8x128xi32> to vector<1x8x128xi32>
    %cst_23 = arith.constant dense<2147483647> : vector<1xi32>
    %56 = vector.multi_reduction <minsi>, %55, %cst_23 [1, 2] : vector<1x8x128xi32> to vector<1xi32>
    %57 = vector.shape_cast %56 : vector<1xi32> to vector<1x1x1xi32>
    %58 = vector.extract %57[0, 0, 0] : i32 from vector<1x1x1xi32>
    %c0_24 = arith.constant 0 : index
    %59 = memref.load %arg3[%c0_24] : memref<1xi32, #tpu.memory_space<smem>>
    memref.store %58, %arg3[%c0_24] : memref<1xi32, #tpu.memory_space<smem>>
    return
  }
}

</mosaic_0001>

<bundles_post_ra>
// kernel: network_forward.1
= control target key start
LH: loop header
LB: loop body
LE: loop exit
PB: predicated region body
PF: predicated region fallthrough
CT: control target
= control target key end

     0   :  { %9 = vsyncpa [#allocation3], 0  ;;  %s366_s0 = inlined_call_operand.vmem [shape: f32[16,128], index: 0, kind: input, shape index: {}]   ;;  %s367_s1 = inlined_call_operand.hbm [shape: f32[520,128], index: 1, kind: input, shape index: {}]   ;;  %s368_s2 = inlined_call_operand.vmem [shape: f32[8,128], index: 2, kind: output, shape index: {0}]   ;;  %s369_s3 = inlined_call_operand.hbm [shape: s32[1], index: 3, kind: output, shape index: {1}]  }
   0x1   :  { %10 = vsyncpa [#allocation4], 0  ;;  %s17_s14 = sshll.u32 %s367_s1, 4  ;;  %s319_s15 = smov [#allocation2]   ;;  %s18_s14 = int_to_ptr.hbm [resolvable:$true] %s17_s14 }
   0x2   :  { %s19_s16 = sshll.u32 %s319_s15, 4  ;;  %s320_s17 = smov 128   ;;  %s20_s16 = int_to_ptr.vmem [resolvable:$true] %s19_s16 }
   0x3   :  { %s321_s18 = smov 8  }
   0x4   :  { %25 = dma.hbm_to_vmem [thread:$0]  %s18_s14, 8320, %s20_s16, [#allocation3], %s320_s17, %s320_s17, %s321_s18  }
   0x5   :  { %315 = dma.done.wait [#allocation3], 8320  }
   0x6   :  { %316 = vsyncadd [#allocation3], 4294958976  ;;  %v47_v0 = vld [vmem:[#allocation2 + $0x78] sm:$0xff]  ;;  %v46_v1 = vld [vmem:[#allocation2 + $0x70] sm:$0xff]  ;;  %s250_s25 = sshll.u32 %s369_s3, 4  ;;  %s322_s27 = smov [#allocation5]   ;;  %s251_s25 = int_to_ptr.hbm [resolvable:$true] %s250_s25 }
   0x7   :  { %50 = vmatpush.msra.mxu0 %v47_v0  ;;  %v45_v2 = vld [vmem:[#allocation2 + $0x68] sm:$0xff]  ;;  %v44_v3 = vld [vmem:[#allocation2 + $0x60] sm:$0xff]  ;;  %v86_v4 = vld [vmem:[#allocation2 + $0xf8] sm:$0xff] }
   0x8   :  { %v43_v5 = vld [vmem:[#allocation2 + $0x58] sm:$0xff]  ;;  %89 = vmatpush.msra.mxu1 %v86_v4  ;;  %v85_v6 = vld [vmem:[#allocation2 + $0xf0] sm:$0xff]  ;;  %v84_v7 = vld [vmem:[#allocation2 + $0xe8] sm:$0xff] }
   0x9   :  { %51 = vmatpush.msra.mxu0 %v46_v1  ;;  %v42_v8 = vld [vmem:[#allocation2 + $0x50] sm:$0xff]  ;;  %v83_v9 = vld [vmem:[#allocation2 + $0xe0] sm:$0xff]  ;;  %v41_v10 = vld [vmem:[#allocation2 + $0x48] sm:$0xff] }
   0xa   :  { %90 = vmatpush.msra.mxu1 %v85_v6  ;;  %v82_v11 = vld [vmem:[#allocation2 + $0xd8] sm:$0xff]  ;;  %v40_v12 = vld [vmem:[#allocation2 + $0x40] sm:$0xff]  ;;  %v81_v13 = vld [vmem:[#allocation2 + $0xd0] sm:$0xff] }
   0xb   :  { %52 = vmatpush.msra.mxu0 %v45_v2  ;;  %v39_v14 = vld [vmem:[#allocation2 + $0x38] sm:$0xff]  ;;  %v80_v15 = vld [vmem:[#allocation2 + $0xc8] sm:$0xff]  ;;  %v38_v16 = vld [vmem:[#allocation2 + $0x30] sm:$0xff] }
   0xc   :  { %91 = vmatpush.msra.mxu1 %v84_v7  ;;  %v79_v17 = vld [vmem:[#allocation2 + $0xc0] sm:$0xff]  ;;  %v37_v18 = vld [vmem:[#allocation2 + $0x28] sm:$0xff]  ;;  %v78_v19 = vld [vmem:[#allocation2 + $0xb8] sm:$0xff] }
   0xd   :  { %53 = vmatpush.msra.mxu0 %v44_v3  ;;  %v36_v20 = vld [vmem:[#allocation2 + $0x20] sm:$0xff]  ;;  %v77_v21 = vld [vmem:[#allocation2 + $0xb0] sm:$0xff]  ;;  %v35_v22 = vld [vmem:[#allocation2 + $0x18] sm:$0xff] }
   0xe   :  { %92 = vmatpush.msra.mxu1 %v83_v9  ;;  %v76_v23 = vld [vmem:[#allocation2 + $0xa8] sm:$0xff]  ;;  %v34_v24 = vld [vmem:[#allocation2 + $0x10] sm:$0xff]  ;;  %v75_v25 = vld [vmem:[#allocation2 + $0xa0] sm:$0xff] }
   0xf   :  { %54 = vmatpush.msra.mxu0 %v43_v5  ;;  %v33_v26 = vld [vmem:[#allocation2 + $0x8] sm:$0xff]  ;;  %v74_v27 = vld [vmem:[#allocation2 + $0x98] sm:$0xff]  ;;  %v32_v28 = vld [vmem:[#allocation2] sm:$0xff] }
  0x10   :  { %93 = vmatpush.msra.mxu1 %v82_v11  ;;  %v30_v29 = vld [vmem:[%s366_s0] sm:$0xff]  ;;  %v73_v30 = vld [vmem:[#allocation2 + $0x90] sm:$0xff]  ;;  %v72_v31 = vld [vmem:[#allocation2 + $0x88] sm:$0xff] }
  0x11   :  { %55 = vmatpush.msra.mxu0 %v42_v8  ;;  %v71_v32 = vld [vmem:[#allocation2 + $0x80] sm:$0xff]  ;;  %v125_v33 = vld [vmem:[#allocation2 + $0x178] sm:$0xff]  ;;  %v124_v34 = vld [vmem:[#allocation2 + $0x170] sm:$0xff] }
  0x12   :  { %94 = vmatpush.msra.mxu1 %v81_v13  ;;  %128 = vmatpush.msra.mxu2 %v125_v33  ;;  %v123_v35 = vld [vmem:[#allocation2 + $0x168] sm:$0xff]  ;;  %v122_v36 = vld [vmem:[#allocation2 + $0x160] sm:$0xff]  ;;  %v121_v37 = vld [vmem:[#allocation2 + $0x158] sm:$0xff] }
  0x13   :  { %56 = vmatpush.msra.mxu0 %v41_v10  ;;  %v120_v38 = vld [vmem:[#allocation2 + $0x150] sm:$0xff]  ;;  %v119_v39 = vld [vmem:[#allocation2 + $0x148] sm:$0xff]  ;;  %v118_v40 = vld [vmem:[#allocation2 + $0x140] sm:$0xff] }
  0x14   :  { %95 = vmatpush.msra.mxu1 %v80_v15  ;;  %129 = vmatpush.msra.mxu2 %v124_v34  ;;  %v117_v41 = vld [vmem:[#allocation2 + $0x138] sm:$0xff]  ;;  %v116_v42 = vld [vmem:[#allocation2 + $0x130] sm:$0xff]  ;;  %v115_v43 = vld [vmem:[#allocation2 + $0x128] sm:$0xff] }
  0x15   :  { %57 = vmatpush.msra.mxu0 %v40_v12  ;;  %v114_v44 = vld [vmem:[#allocation2 + $0x120] sm:$0xff]  ;;  %v113_v45 = vld [vmem:[#allocation2 + $0x118] sm:$0xff]  ;;  %v112_v50 = vld [vmem:[#allocation2 + $0x110] sm:$0xff] }
  0x16   :  { %96 = vmatpush.msra.mxu1 %v79_v17  ;;  %130 = vmatpush.msra.mxu2 %v123_v35  ;;  %v271_v46 = vld [vmem:[#allocation2 + $0x200] ss:$0 sm:$0xff]  ;;  %v111_v51 = vld [vmem:[#allocation2 + $0x108] sm:$0xff]  ;;  %v164_v53 = vld [vmem:[#allocation2 + $0x1f8] sm:$0xff]  ;;  %v188_v17 = vlaneseq }
  0x17   :  { %58 = vmatpush.msra.mxu0 %v39_v14  ;;  %v110_v52 = vld [vmem:[#allocation2 + $0x100] sm:$0xff]  ;;  %v163_v54 = vld [vmem:[#allocation2 + $0x1f0] sm:$0xff]  ;;  %167 = vmatpush.msra.mxu3 %v164_v53  ;;  %v162_v55 = vld [vmem:[#allocation2 + $0x1e8] sm:$0xff] }
  0x18   :  { %97 = vmatpush.msra.mxu1 %v78_v19  ;;  %131 = vmatpush.msra.mxu2 %v122_v36  ;;  %v161_v56 = vld [vmem:[#allocation2 + $0x1e0] sm:$0xff]  ;;  %v160_v57 = vld [vmem:[#allocation2 + $0x1d8] sm:$0xff]  ;;  %v159_v58 = vld [vmem:[#allocation2 + $0x1d0] sm:$0xff]  ;;  %v191_v19 = vand.u32 127, %v188_v17 }
  0x19   :  { %59 = vmatpush.msra.mxu0 %v38_v16  ;;  %168 = vmatpush.msra.mxu3 %v163_v54  ;;  %v158_v59 = vld [vmem:[#allocation2 + $0x1c8] sm:$0xff]  ;;  %v157_v60 = vld [vmem:[#allocation2 + $0x1c0] sm:$0xff]  ;;  %v156_v61 = vld [vmem:[#allocation2 + $0x1b8] sm:$0xff] }
  0x1a   :  { %98 = vmatpush.msra.mxu1 %v77_v21  ;;  %132 = vmatpush.msra.mxu2 %v121_v37  ;;  %v155_v62 = vld [vmem:[#allocation2 + $0x1b0] sm:$0xff]  ;;  %v154_v63 = vld [vmem:[#allocation2 + $0x1a8] sm:$0xff]  ;;  %v153_v0 = vld [vmem:[#allocation2 + $0x1a0] sm:$0xff]  ;;  %vm193_vm1 = vcmp.lt.s32.totalorder %v191_v19, 4 }
  0x1b   :  { %60 = vmatpush.msra.mxu0 %v37_v18  ;;  %169 = vmatpush.msra.mxu3 %v162_v55  ;;  %v152_v1 = vld [vmem:[#allocation2 + $0x198] sm:$0xff]  ;;  %v272_v2 = vld [vmem:[#allocation2 + $0x201] ss:$0 sm:$0xff]  ;;  %v151_v6 = vld [vmem:[#allocation2 + $0x190] sm:$0xff]  ;;  %v189_v18 = vshrl.u32 %v188_v17, 7 }
  0x1c   :  { %99 = vmatpush.msra.mxu1 %v76_v23  ;;  %133 = vmatpush.msra.mxu2 %v120_v38  ;;  %v150_v7 = vld [vmem:[#allocation2 + $0x188] sm:$0xff]  ;;  %v149_v8 = vld [vmem:[#allocation2 + $0x180] sm:$0xff] }
  0x1d   :  { %61 = vmatpush.msra.mxu0 %v36_v20  ;;  %170 = vmatpush.msra.mxu3 %v161_v56  ;;  %v273_v9 = vld [vmem:[#allocation2 + $0x202] ss:$0 sm:$0xff]  ;;  %v31_v13 = vld [vmem:[%s366_s0 + $0x8] sm:$0xff]  ;;  %v274_v21 = vld [vmem:[#allocation2 + $0x203] ss:$0 sm:$0xff]  ;;  %vm192_vm0 = vcmp.lt.s32.totalorder %v189_v18, 2 }
  0x1e   :  { %100 = vmatpush.msra.mxu1 %v75_v25  ;;  %134 = vmatpush.msra.mxu2 %v119_v39  ;;  %275 = vlog2.f32 %v31_v13  ;;  %vm352_vm2 = vmand %vm192_vm0, %vm193_vm1  ;;  %v211_v35 = vmul.u32 4, %v189_v18 }
  0x1f   :  { %62 = vmatpush.msra.mxu0 %v35_v22  ;;  %171 = vmatpush.msra.mxu3 %v160_v57 }
  0x20   :  { %101 = vmatpush.msra.mxu1 %v74_v27  ;;  %135 = vmatpush.msra.mxu2 %v118_v40  ;;  %v212_v36 = vadd.s32 %v211_v35, %v191_v19 }
  0x21   :  { %63 = vmatpush.msra.mxu0 %v34_v24  ;;  %172 = vmatpush.msra.mxu3 %v159_v58 }
  0x22   :  { %102 = vmatpush.msra.mxu1 %v73_v30  ;;  %136 = vmatpush.msra.mxu2 %v117_v41 }
  0x23   :  { %64 = vmatpush.msra.mxu0 %v33_v26  ;;  %173 = vmatpush.msra.mxu3 %v158_v59 }
  0x24   :  { %103 = vmatpush.msra.mxu1 %v72_v31  ;;  %137 = vmatpush.msra.mxu2 %v116_v42  ;;  %v276_v14 = vpop.eup %275 }
  0x25   :  { %65 = vmatpush.msra.mxu0 %v32_v28  ;;  %174 = vmatpush.msra.mxu3 %v157_v60  ;;  %v196_v15 = vmul.f32 0.6931472, %v276_v14 }
  0x26   :  { %66 = vmatmul.f32.vlgmr.msra.gmra.mxu0 %v30_v29  ;;  %104 = vmatpush.msra.mxu1 %v71_v32 }
  0x27   :  { %138 = vmatpush.msra.mxu2 %v115_v43  ;;  %175 = vmatpush.msra.mxu3 %v156_v61  ;;  %v197_v16 = vsub.f32 0.0, %v196_v15 }
  0x29   :  { %139 = vmatpush.msra.mxu2 %v114_v44  ;;  %176 = vmatpush.msra.mxu3 %v155_v62  ;;  %277 = vlog2.f32 %v197_v16 }
  0x2b   :  { %140 = vmatpush.msra.mxu2 %v113_v45  ;;  %177 = vmatpush.msra.mxu3 %v154_v63 }
  0x2d   :  { %141 = vmatpush.msra.mxu2 %v112_v50  ;;  %178 = vmatpush.msra.mxu3 %v153_v0 }
  0x2f   :  { %142 = vmatpush.msra.mxu2 %v111_v51  ;;  %179 = vmatpush.msra.mxu3 %v152_v1  ;;  %v278_v20 = vpop.eup %277 }
  0x30   :  { %v199_v22 = vmul.f32 0.6931472, %v278_v20 }
  0x31   :  { %143 = vmatpush.msra.mxu2 %v110_v52  ;;  %180 = vmatpush.msra.mxu3 %v151_v6 }
  0x33   :  { %181 = vmatpush.msra.mxu3 %v150_v7 }
  0x35   :  { %182 = vmatpush.msra.mxu3 %v149_v8 }
  0xa3   :  { %v67_v47 = vpop.f32.mrf.mxu0 }
  0xa4   :  { %v68_v48 = vadd.f32 %v271_v46, %v67_v47 }
  0xa6   :  { %v70_v49 = vmax.f32 %v68_v48, 0.0 }
  0xa8   :  { %105 = vmatmul.f32.vlgmr.msra.gmra.mxu1 %v70_v49 }
 0x125   :  { %v106_v3 = vpop.f32.mrf.mxu1 }
 0x126   :  { %v107_v4 = vadd.f32 %v272_v2, %v106_v3 }
 0x128   :  { %v109_v5 = vmax.f32 %v107_v4, 0.0 }
 0x12a   :  { %144 = vmatmul.f32.vlgmr.msra.gmra.mxu2 %v109_v5 }
 0x1ad   :  { %v145_v10 = vpop.f32.mrf.mxu2 }
 0x1ae   :  { %v146_v11 = vadd.f32 %v273_v9, %v145_v10 }
 0x1b0   :  { %v148_v12 = vmax.f32 %v146_v11, 0.0 }
 0x1b2   :  { %183 = vmatmul.f32.vlgmr.msra.gmra.mxu3 %v148_v12 }
 0x235   :  { %v184_v23 = vpop.f32.mrf.mxu3 }
 0x236   :  { %v185_v24 = vadd.f32 %v274_v21, %v184_v23 }
 0x238   :  { %187 = vst [vmem:[%s368_s2] sm:$0xff] %v185_v24  ;;  %v200_v26 = vsub.f32 %v185_v24, %v199_v22 }
 0x23a   :  { %v201_v27 = vsel %vm352_vm2, %v200_v26, -inf }
 0x23b   :  { %202 = vmax.xlane.f32.xlu0 %v201_v27 }
 0x2ae   :  { %v203_v28 = vpop.xlane.xlu0 %202 }
 0x2af   :  { %v204_v29 = vrot.slane %v203_v28, 4 }
 0x2b1   :  { %v205_v30 = vmax.f32 %v203_v28, %v204_v29 }
 0x2b3   :  { %v206_v31 = vrot.slane %v205_v30, 2 }
 0x2b5   :  { %v207_v32 = vmax.f32 %v205_v30, %v206_v31 }
 0x2b7   :  { %v208_v33 = vrot.slane %v207_v32, 1 }
 0x2b9   :  { %v209_v34 = vmax.f32 %v207_v32, %v208_v33 }
 0x2bb   :  { %263 = vpush %v209_v34 }
 0x2ec   :  { %s264_s23 = spop %263 }
 0x2ed   :  { %v213_v37 = vstv %s264_s23 }
 0x2ee   :  { %vm214_vm3 = vcmp.eq.f32.partialorder %v201_v27, %v213_v37 }
 0x2ef   :  { %vm215_vm4 = vmand %vm352_vm2, %vm214_vm3 }
 0x2f0   :  { %v216_v38 = vsel %vm215_vm4, %v212_v36, 8 }
 0x2f1   :  { %v218_v39 = vshra.s32 %v216_v38, 16  ;;  %v217_v41 = vand.u32 65535, %v216_v38 }
 0x2f3   :  { %v220_v40 = vcvt.s32.f32 %v218_v39  ;;  %v219_v43 = vcvt.s32.f32 %v217_v41 }
 0x2f5   :  { %221 = vmin.xlane.f32.xlu0 %v220_v40 }
 0x368   :  { %v222_v42 = vpop.xlane.xlu0 %221 }
 0x369   :  { %vm223_vm5 = vcmp.eq.f32.partialorder %v220_v40, %v222_v42  ;;  %v228_v45 = vcvt.f32.s32 %v222_v42 }
 0x36a   :  { %v224_v44 = vsel %vm223_vm5, %v219_v43, inf }
 0x36b   :  { %225 = vmin.xlane.f32.xlu1 %v224_v44  ;;  %v229_v47 = vshll.u32 %v228_v45, 16 }
 0x3de   :  { %v226_v46 = vpop.xlane.xlu1 %225 }
 0x3df   :  { %v227_v48 = vcvt.f32.s32 %v226_v46 }
 0x3e1   :  { %v230_v49 = vadd.s32 %v229_v47, %v227_v48 }
 0x3e3   :  { %v231_v50 = vrot.slane %v230_v49, 4 }
 0x3e5   :  { %vm232_vm6 = vcmp.lt.s32.totalorder %v230_v49, %v231_v50 }
 0x3e6   :  { %v233_v51 = vsel %vm232_vm6, %v230_v49, %v231_v50 }
 0x3e7   :  { %v234_v52 = vrot.slane %v233_v51, 2 }
 0x3e9   :  { %vm235_vm7 = vcmp.lt.s32.totalorder %v233_v51, %v234_v52 }
 0x3ea   :  { %v236_v53 = vsel %vm235_vm7, %v233_v51, %v234_v52 }
 0x3eb   :  { %v237_v54 = vrot.slane %v236_v53, 1 }
 0x3ed   :  { %vm238_vm8 = vcmp.lt.s32.totalorder %v236_v53, %v237_v54 }
 0x3ee   :  { %v239_v55 = vsel %vm238_vm8, %v236_v53, %v237_v54 }
 0x3ef   :  { %265 = vpush %v239_v55 }
 0x420   :  { %s266_s26 = spop %265 }
 0x421   :  { %242 = sst [smem:[#allocation5]] %s266_s26 }
 0x422   :  { %253 = dma.smem_to_hbm %s322_s27, 16, %s251_s25, [#allocation4]  }
 0x423   :  { %317 = dma.done.wait [#allocation4], 16  }
 0x424   :  { %318 = vsyncadd [#allocation4], 4294967280 }
 0x425   :  { %260 = sfence }
 0x426   :  { %261 = vsyncpa [#allocation3], 1 }
 0x427   :  { %262 = vsyncpa [#allocation4], 1 }

</bundles_post_ra>
